<compile_context>
chip_gen: v7x
topology: tpu7x:2x2x1
jax: 0.10.0
libtpu: 0.0.40
codegen_flags: <defaults>
</compile_context>

<pallas_src>
import functools
import math

import jax
import jax.numpy as jnp
from jax import lax
from jax.experimental import pallas as pl
from jax.experimental.pallas import tpu as pltpu


_LN_EPS = 1e-6          # PaSST builds its Blocks with LayerNorm(eps=1e-6)
_NEG_BIG = -1e30        # finite "-inf" for masked (padded) kv columns


def _round_up(n, m):
    return ((n + m - 1) // m) * m


def _pick_tile(n_pad, pref):
    """Largest multiple of 16 that divides n_pad and is <= pref."""
    t = max(16, min(pref, n_pad) - (min(pref, n_pad) % 16))
    while n_pad % t:
        t -= 16
    return t


def _vmem_limit_bytes():
    # ~25% headroom below physical per-core VMEM (64 MiB v7x, 128 MiB v5e/v6e).
    try:
        cap = getattr(pltpu.get_tpu_info(), "vmem_capacity_bytes",
                      64 * 1024 * 1024)
    except Exception:
        cap = 64 * 1024 * 1024
    return int(cap) * 3 // 4


def _resident():
    # Grid-invariant operand: whole array placed once in VMEM (single-buffered).
    return pl.BlockSpec(memory_space=pltpu.MemorySpace.VMEM)


# --------------------------------------------------------------------------
# Stage 1: LN1 + QKV projection -> head-major q / fused kv
# --------------------------------------------------------------------------
def _ln_qkv_kernel(x_ref, ln1_g_ref, ln1_b_ref, wqkv_ref, bqkv_ref,
                   q_ref, kv_ref, *, num_heads):
    x = x_ref[0]                                           # (T1, C) f32
    C = x.shape[-1]
    D = C // num_heads
    scale = D ** -0.5

    mu = jnp.mean(x, axis=-1, keepdims=True)
    var = jnp.mean((x - mu) ** 2, axis=-1, keepdims=True)
    xn = (x - mu) * lax.rsqrt(var + _LN_EPS) * ln1_g_ref[...] + ln1_b_ref[...]

    qkv = jnp.dot(xn.astype(jnp.bfloat16), wqkv_ref[...],
                  preferred_element_type=jnp.float32) + bqkv_ref[...]

    # Head-split once here (amortized over every stage-2 kv revisit); q is
    # pre-scaled by 1/sqrt(D) so the attention scores need no extra multiply.
    for h in range(num_heads):
        q_h = qkv[:, h * D:(h + 1) * D] * scale
        k_h = qkv[:, C + h * D:C + (h + 1) * D]
        v_h = qkv[:, 2 * C + h * D:2 * C + (h + 1) * D]
        q_ref[0, h] = q_h.astype(jnp.bfloat16)
        kv_ref[0, h] = jnp.concatenate([k_h, v_h], axis=-1).astype(jnp.bfloat16)


# --------------------------------------------------------------------------
# Stage 2: flash attention (resident K/V, in-kernel kv loop) + proj +
#          residual + LN2 + MLP
# --------------------------------------------------------------------------
def _attn_mlp_kernel(
    x_ref,       # (1, TQ, C)       f32   residual input rows
    q_ref,       # (1, H, TQ, D)    bf16  head-major, pre-scaled
    kv_ref,      # (1, H, Npad, 2D) bf16  resident per batch (K | V fused)
    wproj_ref,   # (C, C)           bf16
    bproj_ref,   # (1, C)           f32
    ln2_g_ref,   # (1, C)           f32
    ln2_b_ref,   # (1, C)           f32
    w1_ref,      # (C, Hid)         bf16
    b1_ref,      # (1, Hid)         f32
    w2_ref,      # (Hid, C)         bf16
    b2_ref,      # (1, C)           f32
    o_ref,       # (1, TQ, C)       f32
    acc_ref,     # (H, TQ, D)       f32 scratch (head-major attention accum)
    *, num_heads, kv_tile, n_valid, n_pad,
):
    H = num_heads
    TQ = q_ref.shape[2]
    D = q_ref.shape[3]
    tk = kv_tile
    num_kv = n_pad // tk

    qh = q_ref[0]                                          # (H, TQ, D) bf16
    acc_ref[...] = jnp.zeros_like(acc_ref)
    m0 = jnp.full((H, TQ, 1), _NEG_BIG, jnp.float32)
    l0 = jnp.zeros((H, TQ, 1), jnp.float32)

    def kv_step(start, m_prev, l_prev, masked):
        kv = kv_ref[0, :, pl.ds(start, tk), :]             # (H, TK, 2D) bf16
        kh = kv[:, :, :D]
        vh = kv[:, :, D:]
        # Head-batched q.k^T  (contraction over D; batch over heads).
        s = lax.dot_general(qh, kh,
                            dimension_numbers=(((2,), (2,)), ((0,), (0,))),
                            preferred_element_type=jnp.float32)  # (H, TQ, TK)
        if masked:
            col = start + lax.broadcasted_iota(jnp.int32, (1, 1, tk), 2)
            s = jnp.where(col < n_valid, s, _NEG_BIG)
        m_new = jnp.maximum(m_prev, jnp.max(s, axis=-1, keepdims=True))
        alpha = jnp.exp(m_prev - m_new)
        p = jnp.exp(s - m_new)
        l_new = alpha * l_prev + jnp.sum(p, axis=-1, keepdims=True)
        pv = lax.dot_general(p.astype(jnp.bfloat16), vh,
                             dimension_numbers=(((2,), (1,)), ((0,), (0,))),
                             preferred_element_type=jnp.float32)  # (H, TQ, D)
        acc_ref[...] = alpha * acc_ref[...] + pv           # full-width update
        return m_new, l_new

    def loop_body(j, carry):
        m_prev, l_prev = carry
        start = pl.multiple_of(j * tk, tk)
        return kv_step(start, m_prev, l_prev, masked=False)

    if n_valid == n_pad:
        m_f, l_f = lax.fori_loop(0, num_kv, loop_body, (m0, l0))
    else:
        # Padding < 16 <= tk, so only the final kv tile needs masking.
        m_f, l_f = lax.fori_loop(0, num_kv - 1, loop_body, (m0, l0))
        m_f, l_f = kv_step((num_kv - 1) * tk, m_f, l_f, masked=True)

    # ---- finalize: normalize + proj + residual + LN2 + MLP ---------------
    inv_l = pl.reciprocal(l_f, approx=True)                # (H, TQ, 1)
    scaled = acc_ref[...] * inv_l                          # (H, TQ, D)
    # Re-assemble token-major context via lane concatenation (col = h*D + d).
    ctx = jnp.concatenate([scaled[h] for h in range(H)],
                          axis=-1).astype(jnp.bfloat16)    # (TQ, C)

    attn_out = jnp.dot(ctx, wproj_ref[...],
                       preferred_element_type=jnp.float32) + bproj_ref[...]
    xr = x_ref[0] + attn_out                               # (TQ, C) f32

    mu = jnp.mean(xr, axis=-1, keepdims=True)
    var = jnp.mean((xr - mu) ** 2, axis=-1, keepdims=True)
    xn2 = (xr - mu) * lax.rsqrt(var + _LN_EPS) * ln2_g_ref[...] + ln2_b_ref[...]

    h1 = jnp.dot(xn2.astype(jnp.bfloat16), w1_ref[...],
                 preferred_element_type=jnp.float32) + b1_ref[...]
    # exact GELU (PyTorch nn.GELU default): 0.5*x*(1+erf(x/sqrt(2)))
    h1 = 0.5 * h1 * (1.0 + lax.erf(h1 * (1.0 / math.sqrt(2.0))))
    mlp_out = jnp.dot(h1.astype(jnp.bfloat16), w2_ref[...],
                      preferred_element_type=jnp.float32) + b2_ref[...]

    o_ref[0] = xr + mlp_out


# --------------------------------------------------------------------------
# Wrapper
# --------------------------------------------------------------------------
def block_forward(x, params, *, num_heads, q_tile=256, kv_tile=256, s1_tile=512):
    """x: (B, N, C) float32.  params: dict of weights (see init_params).

    Defaults (q/kv tile 256, stage-1 tile 512) target v6e/v7x; 128-256 tiles
    remain fine on v5e.  Ragged N is padded to a multiple of 16 and masked.
    """
    B, N, C = x.shape
    assert C % num_heads == 0
    H = num_heads
    D = C // num_heads

    n_pad = _round_up(N, 16)
    tq = _pick_tile(n_pad, q_tile)
    tk = _pick_tile(n_pad, kv_tile)
    t1 = _pick_tile(n_pad, s1_tile)
    vmem_limit = _vmem_limit_bytes()

    x_p = x if n_pad == N else jnp.pad(x, ((0, 0), (0, n_pad - N), (0, 0)))

    # ---- Stage 1: LN1 + QKV -> head-major q / fused K|V --------------------
    q, kv = pl.pallas_call(
        functools.partial(_ln_qkv_kernel, num_heads=H),
        out_shape=(
            jax.ShapeDtypeStruct((B, H, n_pad, D), jnp.bfloat16),
            jax.ShapeDtypeStruct((B, H, n_pad, 2 * D), jnp.bfloat16),
        ),
        grid_spec=pltpu.PrefetchScalarGridSpec(
            num_scalar_prefetch=0,
            grid=(B, n_pad // t1),
            in_specs=[
                pl.BlockSpec((1, t1, C), lambda b, i: (b, i, 0)),   # x rows
                _resident(),                                        # ln1 gamma
                _resident(),                                        # ln1 beta
                _resident(),                                        # qkv weight
                _resident(),                                        # qkv bias
            ],
            out_specs=(
                pl.BlockSpec((1, H, t1, D), lambda b, i: (b, 0, i, 0)),
                pl.BlockSpec((1, H, t1, 2 * D), lambda b, i: (b, 0, i, 0)),
            ),
        ),
        compiler_params=pltpu.CompilerParams(
            dimension_semantics=("parallel", "parallel"),
            vmem_limit_bytes=vmem_limit),
    )(x_p, params["ln1_g"], params["ln1_b"], params["wqkv"], params["bqkv"])

    # ---- Stage 2: flash attention + proj + residual + LN2 + MLP ------------
    out = pl.pallas_call(
        functools.partial(_attn_mlp_kernel, num_heads=H, kv_tile=tk,
                          n_valid=N, n_pad=n_pad),
        out_shape=jax.ShapeDtypeStruct((B, n_pad, C), jnp.float32),
        grid_spec=pltpu.PrefetchScalarGridSpec(
            num_scalar_prefetch=0,
            grid=(B, n_pad // tq),
            in_specs=[
                pl.BlockSpec((1, tq, C), lambda b, i: (b, i, 0)),        # x rows
                pl.BlockSpec((1, H, tq, D), lambda b, i: (b, 0, i, 0)),  # q rows
                pl.BlockSpec((1, H, n_pad, 2 * D),
                             lambda b, i: (b, 0, 0, 0)),     # K/V resident per b
                _resident(),   # wproj
                _resident(),   # bproj
                _resident(),   # ln2 gamma
                _resident(),   # ln2 beta
                _resident(),   # fc1 weight
                _resident(),   # fc1 bias
                _resident(),   # fc2 weight
                _resident(),   # fc2 bias
            ],
            out_specs=pl.BlockSpec((1, tq, C), lambda b, i: (b, i, 0)),
            scratch_shapes=[
                pltpu.VMEM((H, tq, D), jnp.float32),   # head-major attn accum
            ],
        ),
        compiler_params=pltpu.CompilerParams(
            dimension_semantics=("parallel", "parallel"),
            vmem_limit_bytes=vmem_limit),
    )(x_p, q, kv,
      params["wproj"], params["bproj"],
      params["ln2_g"], params["ln2_b"],
      params["w1"], params["b1"],
      params["w2"], params["b2"])

    return out if n_pad == N else out[:, :N, :]


def init_params(key, dim, num_heads, mlp_ratio=4.0):
    hid = int(dim * mlp_ratio)
    ks = jax.random.split(key, 10)
    s = 0.02
    f32, bf16 = jnp.float32, jnp.bfloat16
    return {
        "ln1_g": jnp.ones((1, dim), f32),
        "ln1_b": jnp.zeros((1, dim), f32),
        # PaSST instantiates Block with qkv_bias=True.
        "wqkv": (s * jax.random.normal(ks[0], (dim, 3 * dim), f32)).astype(bf16),
        "bqkv": s * jax.random.normal(ks[1], (1, 3 * dim), f32),
        "wproj": (s * jax.random.normal(ks[2], (dim, dim), f32)).astype(bf16),
        "bproj": s * jax.random.normal(ks[3], (1, dim), f32),
        "ln2_g": jnp.ones((1, dim), f32),
        "ln2_b": jnp.zeros((1, dim), f32),
        "w1": (s * jax.random.normal(ks[4], (dim, hid), f32)).astype(bf16),
        "b1": s * jax.random.normal(ks[5], (1, hid), f32),
        "w2": (s * jax.random.normal(ks[6], (hid, dim), f32)).astype(bf16),
        "b2": s * jax.random.normal(ks[7], (1, dim), f32),
    }


def _reference(x, p, num_heads):
    """Pure-JAX f32 reference of Block.forward (weights upcast from bf16)."""
    B, N, C = x.shape
    D = C // num_heads
    f32 = lambda a: a.astype(jnp.float32)

    def ln(z, g, b):
        mu = z.mean(-1, keepdims=True)
        var = ((z - mu) ** 2).mean(-1, keepdims=True)
        return (z - mu) / jnp.sqrt(var + _LN_EPS) * g + b

    xn = ln(x, p["ln1_g"][0], p["ln1_b"][0])
    qkv = xn @ f32(p["wqkv"]) + p["bqkv"][0]
    q, k, v = jnp.split(qkv, 3, axis=-1)
    qh = q.reshape(B, N, num_heads, D).transpose(0, 2, 1, 3)
    kh = k.reshape(B, N, num_heads, D).transpose(0, 2, 1, 3)
    vh = v.reshape(B, N, num_heads, D).transpose(0, 2, 1, 3)
    attn = jnp.einsum('bhqd,bhkd->bhqk', qh, kh) * (D ** -0.5)
    attn = jax.nn.softmax(attn, axis=-1)
    ctx = jnp.einsum('bhqk,bhkd->bhqd', attn, vh)
    ctx = ctx.transpose(0, 2, 1, 3).reshape(B, N, C)
    x = x + (ctx @ f32(p["wproj"]) + p["bproj"][0])
    xn2 = ln(x, p["ln2_g"][0], p["ln2_b"][0])
    h = xn2 @ f32(p["w1"]) + p["b1"][0]
    h = 0.5 * h * (1.0 + jax.lax.erf(h / jnp.sqrt(2.0)))
    return x + (h @ f32(p["w2"]) + p["b2"][0])


if __name__ == "__main__":
    # Small shapes: N=30 (not a multiple of 16) exercises the pad+mask path,
    # and 16-wide tiles exercise the multi-tile flash recurrence
    # (2 q-tiles x 2 kv-tiles per batch element).
    B, N, C, num_heads = 2, 30, 64, 4
    key = jax.random.PRNGKey(0)
    kx, kp = jax.random.split(key)
    x = jax.random.normal(kx, (B, N, C), jnp.float32)
    params = init_params(kp, C, num_heads, mlp_ratio=4.0)

    out = block_forward(x, params, num_heads=num_heads,
                        q_tile=16, kv_tile=16, s1_tile=16)
    out = jax.block_until_ready(out)

    ref = _reference(x, params, num_heads)
    assert out.shape == (B, N, C)
    max_err = float(jnp.max(jnp.abs(out - ref)))
    assert jnp.allclose(out, ref, atol=3e-2, rtol=3e-2), (
        f"mismatch vs reference, max abs err={max_err}")

    print("KERNEL_OK")
</pallas_src>

<mosaic_0001>
module attributes {stable_mosaic.version = 11 : i64} {
  func.func @_ln_qkv_kernel(%arg0: i32, %arg1: i32, %arg2: memref<1x16x64xf32, #tpu.memory_space<vmem>>, %arg3: memref<1x64xf32, #tpu.memory_space<vmem>>, %arg4: memref<1x64xf32, #tpu.memory_space<vmem>>, %arg5: memref<64x192xbf16, #tpu.memory_space<vmem>>, %arg6: memref<1x192xf32, #tpu.memory_space<vmem>>, %arg7: memref<1x4x16x16xbf16, #tpu.memory_space<vmem>>, %arg8: memref<1x4x16x32xbf16, #tpu.memory_space<vmem>>) attributes {dimension_semantics = [#tpu.dimension_semantics<parallel>, #tpu.dimension_semantics<parallel>], iteration_bounds = array<i64: 2, 2>, scalar_prefetch = 0 : i64, scratch_operands = 0 : i64, tpu.core_type = #tpu.core_type<tc>, window_params = [{transform_indices = @transform_0, window_bounds = array<i64: 1, 16, 64>}, {pipeline_mode = #tpu.pipeline_mode<synchronous>, transform_indices = @transform_1, window_bounds = array<i64: 1, 64>}, {pipeline_mode = #tpu.pipeline_mode<synchronous>, transform_indices = @transform_2, window_bounds = array<i64: 1, 64>}, {pipeline_mode = #tpu.pipeline_mode<synchronous>, transform_indices = @transform_3, window_bounds = array<i64: 64, 192>}, {pipeline_mode = #tpu.pipeline_mode<synchronous>, transform_indices = @transform_4, window_bounds = array<i64: 1, 192>}, {transform_indices = @transform_5, window_bounds = array<i64: 1, 4, 16, 16>}, {transform_indices = @transform_6, window_bounds = array<i64: 1, 4, 16, 32>}]} {
    %c0 = arith.constant 0 : index
    %c0_0 = arith.constant 0 : index
    %c0_1 = arith.constant 0 : index
    %0 = vector.load %arg2[%c0, %c0_0, %c0_1] : memref<1x16x64xf32, #tpu.memory_space<vmem>>, vector<1x16x64xf32>
    %1 = vector.shape_cast %0 : vector<1x16x64xf32> to vector<16x64xf32>
    %cst = arith.constant dense<0.000000e+00> : vector<16xf32>
    %2 = vector.multi_reduction <add>, %1, %cst [1] : vector<16x64xf32> to vector<16xf32>
    %3 = vector.shape_cast %2 : vector<16xf32> to vector<16x1xf32>
    %cst_2 = arith.constant 6.400000e+01 : f32
    %4 = vector.broadcast %cst_2 : f32 to vector<16x1xf32>
    %5 = arith.divf %3, %4 : vector<16x1xf32>
    %6 = vector.broadcast %5 : vector<16x1xf32> to vector<16x64xf32>
    %7 = arith.subf %1, %6 : vector<16x64xf32>
    %8 = arith.mulf %7, %7 : vector<16x64xf32>
    %cst_3 = arith.constant dense<0.000000e+00> : vector<16xf32>
    %9 = vector.multi_reduction <add>, %8, %cst_3 [1] : vector<16x64xf32> to vector<16xf32>
    %10 = vector.shape_cast %9 : vector<16xf32> to vector<16x1xf32>
    %cst_4 = arith.constant 6.400000e+01 : f32
    %11 = vector.broadcast %cst_4 : f32 to vector<16x1xf32>
    %12 = arith.divf %10, %11 : vector<16x1xf32>
    %13 = vector.broadcast %5 : vector<16x1xf32> to vector<16x64xf32>
    %14 = arith.subf %1, %13 : vector<16x64xf32>
    %cst_5 = arith.constant 9.99999997E-7 : f32
    %15 = vector.broadcast %cst_5 : f32 to vector<16x1xf32>
    %16 = arith.addf %12, %15 : vector<16x1xf32>
    %17 = math.rsqrt %16 : vector<16x1xf32>
    %18 = vector.broadcast %17 : vector<16x1xf32> to vector<16x64xf32>
    %19 = arith.mulf %14, %18 : vector<16x64xf32>
    %c0_6 = arith.constant 0 : index
    %c0_7 = arith.constant 0 : index
    %20 = vector.load %arg3[%c0_6, %c0_7] : memref<1x64xf32, #tpu.memory_space<vmem>>, vector<1x64xf32>
    %21 = vector.broadcast %20 : vector<1x64xf32> to vector<16x64xf32>
    %22 = arith.mulf %19, %21 : vector<16x64xf32>
    %c0_8 = arith.constant 0 : index
    %c0_9 = arith.constant 0 : index
    %23 = vector.load %arg4[%c0_8, %c0_9] : memref<1x64xf32, #tpu.memory_space<vmem>>, vector<1x64xf32>
    %24 = vector.broadcast %23 : vector<1x64xf32> to vector<16x64xf32>
    %25 = arith.addf %22, %24 : vector<16x64xf32>
    %26 = arith.truncf %25 : vector<16x64xf32> to vector<16x64xbf16>
    %c0_10 = arith.constant 0 : index
    %c0_11 = arith.constant 0 : index
    %27 = vector.load %arg5[%c0_10, %c0_11] : memref<64x192xbf16, #tpu.memory_space<vmem>>, vector<64x192xbf16>
    %cst_12 = arith.constant dense<0.000000e+00> : vector<16x192xf32>
    %28 = tpu.matmul %26, %27, %cst_12 {dimension_numbers = #tpu.dot_dimension_numbers<[1], [0], [0], [1], [0, 0, 1, 1], [], []>} : vector<16x64xbf16>, vector<64x192xbf16>, vector<16x192xf32> -> vector<16x192xf32>
    %c0_13 = arith.constant 0 : index
    %c0_14 = arith.constant 0 : index
    %29 = vector.load %arg6[%c0_13, %c0_14] : memref<1x192xf32, #tpu.memory_space<vmem>>, vector<1x192xf32>
    %30 = vector.broadcast %29 : vector<1x192xf32> to vector<16x192xf32>
    %31 = arith.addf %28, %30 : vector<16x192xf32>
    %32 = vector.extract_strided_slice %31 {offsets = [0, 0], sizes = [16, 16], strides = [1, 1]} : vector<16x192xf32> to vector<16x16xf32>
    %cst_15 = arith.constant 2.500000e-01 : f32
    %33 = vector.broadcast %cst_15 : f32 to vector<16x16xf32>
    %34 = arith.mulf %32, %33 : vector<16x16xf32>
    %35 = vector.extract_strided_slice %31 {offsets = [0, 64], sizes = [16, 16], strides = [1, 1]} : vector<16x192xf32> to vector<16x16xf32>
    %36 = vector.extract_strided_slice %31 {offsets = [0, 128], sizes = [16, 16], strides = [1, 1]} : vector<16x192xf32> to vector<16x16xf32>
    %37 = arith.truncf %34 : vector<16x16xf32> to vector<16x16xbf16>
    %c0_16 = arith.constant 0 : index
    %c0_17 = arith.constant 0 : index
    %c0_18 = arith.constant 0 : index
    %c0_19 = arith.constant 0 : index
    %38 = vector.load %arg7[%c0_16, %c0_17, %c0_18, %c0_19] : memref<1x4x16x16xbf16, #tpu.memory_space<vmem>>, vector<1x1x16x16xbf16>
    %39 = vector.shape_cast %38 : vector<1x1x16x16xbf16> to vector<16x16xbf16>
    %40 = vector.shape_cast %37 : vector<16x16xbf16> to vector<1x1x16x16xbf16>
    tpu.vector_store %arg7[%c0_16, %c0_17, %c0_18, %c0_19], %40 {strides = array<i32>} : memref<1x4x16x16xbf16, #tpu.memory_space<vmem>>, vector<1x1x16x16xbf16>,
    %41 = tpu.concatenate %35, %36 in 1 : vector<16x16xf32>, vector<16x16xf32> -> vector<16x32xf32>
    %42 = arith.truncf %41 : vector<16x32xf32> to vector<16x32xbf16>
    %c0_20 = arith.constant 0 : index
    %c0_21 = arith.constant 0 : index
    %c0_22 = arith.constant 0 : index
    %c0_23 = arith.constant 0 : index
    %43 = vector.load %arg8[%c0_20, %c0_21, %c0_22, %c0_23] : memref<1x4x16x32xbf16, #tpu.memory_space<vmem>>, vector<1x1x16x32xbf16>
    %44 = vector.shape_cast %43 : vector<1x1x16x32xbf16> to vector<16x32xbf16>
    %45 = vector.shape_cast %42 : vector<16x32xbf16> to vector<1x1x16x32xbf16>
    tpu.vector_store %arg8[%c0_20, %c0_21, %c0_22, %c0_23], %45 {strides = array<i32>} : memref<1x4x16x32xbf16, #tpu.memory_space<vmem>>, vector<1x1x16x32xbf16>,
    %46 = vector.extract_strided_slice %31 {offsets = [0, 16], sizes = [16, 16], strides = [1, 1]} : vector<16x192xf32> to vector<16x16xf32>
    %cst_24 = arith.constant 2.500000e-01 : f32
    %47 = vector.broadcast %cst_24 : f32 to vector<16x16xf32>
    %48 = arith.mulf %46, %47 : vector<16x16xf32>
    %49 = vector.extract_strided_slice %31 {offsets = [0, 80], sizes = [16, 16], strides = [1, 1]} : vector<16x192xf32> to vector<16x16xf32>
    %50 = vector.extract_strided_slice %31 {offsets = [0, 144], sizes = [16, 16], strides = [1, 1]} : vector<16x192xf32> to vector<16x16xf32>
    %51 = arith.truncf %48 : vector<16x16xf32> to vector<16x16xbf16>
    %c0_25 = arith.constant 0 : index
    %c1 = arith.constant 1 : index
    %c0_26 = arith.constant 0 : index
    %c0_27 = arith.constant 0 : index
    %52 = vector.load %arg7[%c0_25, %c1, %c0_26, %c0_27] : memref<1x4x16x16xbf16, #tpu.memory_space<vmem>>, vector<1x1x16x16xbf16>
    %53 = vector.shape_cast %52 : vector<1x1x16x16xbf16> to vector<16x16xbf16>
    %54 = vector.shape_cast %51 : vector<16x16xbf16> to vector<1x1x16x16xbf16>
    tpu.vector_store %arg7[%c0_25, %c1, %c0_26, %c0_27], %54 {strides = array<i32>} : memref<1x4x16x16xbf16, #tpu.memory_space<vmem>>, vector<1x1x16x16xbf16>,
    %55 = tpu.concatenate %49, %50 in 1 : vector<16x16xf32>, vector<16x16xf32> -> vector<16x32xf32>
    %56 = arith.truncf %55 : vector<16x32xf32> to vector<16x32xbf16>
    %c0_28 = arith.constant 0 : index
    %c1_29 = arith.constant 1 : index
    %c0_30 = arith.constant 0 : index
    %c0_31 = arith.constant 0 : index
    %57 = vector.load %arg8[%c0_28, %c1_29, %c0_30, %c0_31] : memref<1x4x16x32xbf16, #tpu.memory_space<vmem>>, vector<1x1x16x32xbf16>
    %58 = vector.shape_cast %57 : vector<1x1x16x32xbf16> to vector<16x32xbf16>
    %59 = vector.shape_cast %56 : vector<16x32xbf16> to vector<1x1x16x32xbf16>
    tpu.vector_store %arg8[%c0_28, %c1_29, %c0_30, %c0_31], %59 {strides = array<i32>} : memref<1x4x16x32xbf16, #tpu.memory_space<vmem>>, vector<1x1x16x32xbf16>,
    %60 = vector.extract_strided_slice %31 {offsets = [0, 32], sizes = [16, 16], strides = [1, 1]} : vector<16x192xf32> to vector<16x16xf32>
    %cst_32 = arith.constant 2.500000e-01 : f32
    %61 = vector.broadcast %cst_32 : f32 to vector<16x16xf32>
    %62 = arith.mulf %60, %61 : vector<16x16xf32>
    %63 = vector.extract_strided_slice %31 {offsets = [0, 96], sizes = [16, 16], strides = [1, 1]} : vector<16x192xf32> to vector<16x16xf32>
    %64 = vector.extract_strided_slice %31 {offsets = [0, 160], sizes = [16, 16], strides = [1, 1]} : vector<16x192xf32> to vector<16x16xf32>
    %65 = arith.truncf %62 : vector<16x16xf32> to vector<16x16xbf16>
    %c0_33 = arith.constant 0 : index
    %c2 = arith.constant 2 : index
    %c0_34 = arith.constant 0 : index
    %c0_35 = arith.constant 0 : index
    %66 = vector.load %arg7[%c0_33, %c2, %c0_34, %c0_35] : memref<1x4x16x16xbf16, #tpu.memory_space<vmem>>, vector<1x1x16x16xbf16>
    %67 = vector.shape_cast %66 : vector<1x1x16x16xbf16> to vector<16x16xbf16>
    %68 = vector.shape_cast %65 : vector<16x16xbf16> to vector<1x1x16x16xbf16>
    tpu.vector_store %arg7[%c0_33, %c2, %c0_34, %c0_35], %68 {strides = array<i32>} : memref<1x4x16x16xbf16, #tpu.memory_space<vmem>>, vector<1x1x16x16xbf16>,
    %69 = tpu.concatenate %63, %64 in 1 : vector<16x16xf32>, vector<16x16xf32> -> vector<16x32xf32>
    %70 = arith.truncf %69 : vector<16x32xf32> to vector<16x32xbf16>
    %c0_36 = arith.constant 0 : index
    %c2_37 = arith.constant 2 : index
    %c0_38 = arith.constant 0 : index
    %c0_39 = arith.constant 0 : index
    %71 = vector.load %arg8[%c0_36, %c2_37, %c0_38, %c0_39] : memref<1x4x16x32xbf16, #tpu.memory_space<vmem>>, vector<1x1x16x32xbf16>
    %72 = vector.shape_cast %71 : vector<1x1x16x32xbf16> to vector<16x32xbf16>
    %73 = vector.shape_cast %70 : vector<16x32xbf16> to vector<1x1x16x32xbf16>
    tpu.vector_store %arg8[%c0_36, %c2_37, %c0_38, %c0_39], %73 {strides = array<i32>} : memref<1x4x16x32xbf16, #tpu.memory_space<vmem>>, vector<1x1x16x32xbf16>,
    %74 = vector.extract_strided_slice %31 {offsets = [0, 48], sizes = [16, 16], strides = [1, 1]} : vector<16x192xf32> to vector<16x16xf32>
    %cst_40 = arith.constant 2.500000e-01 : f32
    %75 = vector.broadcast %cst_40 : f32 to vector<16x16xf32>
    %76 = arith.mulf %74, %75 : vector<16x16xf32>
    %77 = vector.extract_strided_slice %31 {offsets = [0, 112], sizes = [16, 16], strides = [1, 1]} : vector<16x192xf32> to vector<16x16xf32>
    %78 = vector.extract_strided_slice %31 {offsets = [0, 176], sizes = [16, 16], strides = [1, 1]} : vector<16x192xf32> to vector<16x16xf32>
    %79 = arith.truncf %76 : vector<16x16xf32> to vector<16x16xbf16>
    %c0_41 = arith.constant 0 : index
    %c3 = arith.constant 3 : index
    %c0_42 = arith.constant 0 : index
    %c0_43 = arith.constant 0 : index
    %80 = vector.load %arg7[%c0_41, %c3, %c0_42, %c0_43] : memref<1x4x16x16xbf16, #tpu.memory_space<vmem>>, vector<1x1x16x16xbf16>
    %81 = vector.shape_cast %80 : vector<1x1x16x16xbf16> to vector<16x16xbf16>
    %82 = vector.shape_cast %79 : vector<16x16xbf16> to vector<1x1x16x16xbf16>
    tpu.vector_store %arg7[%c0_41, %c3, %c0_42, %c0_43], %82 {strides = array<i32>} : memref<1x4x16x16xbf16, #tpu.memory_space<vmem>>, vector<1x1x16x16xbf16>,
    %83 = tpu.concatenate %77, %78 in 1 : vector<16x16xf32>, vector<16x16xf32> -> vector<16x32xf32>
    %84 = arith.truncf %83 : vector<16x32xf32> to vector<16x32xbf16>
    %c0_44 = arith.constant 0 : index
    %c3_45 = arith.constant 3 : index
    %c0_46 = arith.constant 0 : index
    %c0_47 = arith.constant 0 : index
    %85 = vector.load %arg8[%c0_44, %c3_45, %c0_46, %c0_47] : memref<1x4x16x32xbf16, #tpu.memory_space<vmem>>, vector<1x1x16x32xbf16>
    %86 = vector.shape_cast %85 : vector<1x1x16x32xbf16> to vector<16x32xbf16>
    %87 = vector.shape_cast %84 : vector<16x32xbf16> to vector<1x1x16x32xbf16>
    tpu.vector_store %arg8[%c0_44, %c3_45, %c0_46, %c0_47], %87 {strides = array<i32>} : memref<1x4x16x32xbf16, #tpu.memory_space<vmem>>, vector<1x1x16x32xbf16>,
    return
  }
  func.func @transform_0(%arg0: i32, %arg1: i32) -> (i32, i32, i32) {
    %c0_i32 = arith.constant 0 : i32
    %c0_i32_0 = arith.constant 0 : i32
    return %arg0, %arg1, %c0_i32 : i32, i32, i32
  }
  func.func @transform_1(%arg0: i32, %arg1: i32) -> (i32, i32) {
    %c0_i32 = arith.constant 0 : i32
    %c0_i32_0 = arith.constant 0 : i32
    %c0_i32_1 = arith.constant 0 : i32
    return %c0_i32, %c0_i32_0 : i32, i32
  }
  func.func @transform_2(%arg0: i32, %arg1: i32) -> (i32, i32) {
    %c0_i32 = arith.constant 0 : i32
    %c0_i32_0 = arith.constant 0 : i32
    %c0_i32_1 = arith.constant 0 : i32
    return %c0_i32, %c0_i32_0 : i32, i32
  }
  func.func @transform_3(%arg0: i32, %arg1: i32) -> (i32, i32) {
    %c0_i32 = arith.constant 0 : i32
    %c0_i32_0 = arith.constant 0 : i32
    %c0_i32_1 = arith.constant 0 : i32
    return %c0_i32, %c0_i32_0 : i32, i32
  }
  func.func @transform_4(%arg0: i32, %arg1: i32) -> (i32, i32) {
    %c0_i32 = arith.constant 0 : i32
    %c0_i32_0 = arith.constant 0 : i32
    %c0_i32_1 = arith.constant 0 : i32
    return %c0_i32, %c0_i32_0 : i32, i32
  }
  func.func @transform_5(%arg0: i32, %arg1: i32) -> (i32, i32, i32, i32) {
    %c0_i32 = arith.constant 0 : i32
    %c0_i32_0 = arith.constant 0 : i32
    %c0_i32_1 = arith.constant 0 : i32
    return %arg0, %c0_i32, %arg1, %c0_i32_0 : i32, i32, i32, i32
  }
  func.func @transform_6(%arg0: i32, %arg1: i32) -> (i32, i32, i32, i32) {
    %c0_i32 = arith.constant 0 : i32
    %c0_i32_0 = arith.constant 0 : i32
    %c0_i32_1 = arith.constant 0 : i32
    return %arg0, %c0_i32, %arg1, %c0_i32_0 : i32, i32, i32, i32
  }
}

</mosaic_0001>

<bundles_post_ra>
// kernel: tpu_custom_call.1
= control target key start
LH: loop header
LB: loop body
LE: loop exit
PB: predicated region body
PF: predicated region fallthrough
CT: control target
= control target key end

     0   :  { %s1596_s0 = inlined_call_operand.hbm [shape: f32[2,32,64], index: 0, kind: input, shape index: {}]   ;;  %s1597_s1 = inlined_call_operand.vmem [shape: f32[1,64], index: 1, kind: input, shape index: {}]   ;;  %s1598_s2 = inlined_call_operand.vmem [shape: f32[1,64], index: 2, kind: input, shape index: {}]   ;;  %s1599_s3 = inlined_call_operand.hbm [shape: bf16[64,192], index: 3, kind: input, shape index: {}]   ;;  %s1600_s4 = inlined_call_operand.vmem [shape: f32[1,192], index: 4, kind: input, shape index: {}]   ;;  %s1601_s5 = inlined_call_operand.vmem [shape: bf16[2,4,32,16], index: 5, kind: output, shape index: {0}]   ;;  %s1602_s6 = inlined_call_operand.hbm [shape: bf16[2,4,32,32], index: 6, kind: output, shape index: {1}]  }
   0x1   :  { %1614 = sst [smem:[#allocation19_spill]] %s1599_s3 }
   0x2   :  { %1615 = sst [smem:[#allocation20_spill]] %s1601_s5 }
   0x3   :  { %1616 = sst [smem:[#allocation21_spill]] %s1602_s6 }
   0x4   :  { %12 = vsyncpa [#allocation3], 0 }
   0x5   :  { %14 = vsyncpa [#allocation3 + $0x1], 0 }
   0x6   :  { %15 = vsyncpa [#allocation6], 0 }
   0x7   :  { %16 = vsyncpa [#allocation4], 0 }
   0x8   :  { %18 = vsyncpa [#allocation4 + $0x1], 0  ;;  %s1283_s21 = smov 0   ;;  %s1285_s22 = smov 0  }
   0x9   :  { %s1287_s23 = smov 0   ;;  %s1289_s24 = smov 0  }
   0xa   :  { %s1291_s25 = smov 0   ;;  %s1293_s26 = smov 0  }
   0xb   :  { %s1295_s27 = smov 0   ;;  %s1297_s28 = smov 0  }
   0xc LB: > { %1617 = sst [smem:[#allocation14_spill]] %s1199_s21  ;;  %s865_s29 = sadd.s32 4294967295, %s1227_s28   ;;  %s1227_s28 = sphi %s1297_s28, %s24_s28   ;;  %s1223_s27 = sphi %s1295_s27, %s1650_s27   ;;  %s1219_s26 = sphi %s1293_s26, %s1644_s26   ;;  %s1215_s25 = sphi %s1291_s25, %s1649_s25   ;;  %s1211_s24 = sphi %s1289_s24, %s1643_s24   ;;  %s1207_s23 = sphi %s1287_s23, %s1648_s23   ;;  %s1203_s22 = sphi %s1285_s22, %s1647_s22   ;;  %s1199_s21 = sphi %s1283_s21, %s1646_s21  }
   0xd   : > { %1618 = sst [smem:[#allocation15_spill]] %s1219_s26  ;;  %s866_s30 = sadd.s32 4294967294, %s1227_s28  }
   0xe   : > { %p58_p0 = scmp.ne.s32.totalorder %s1203_s22, %s1199_s21  ;;  %p1327_p1 = scmp.eq.s32.totalorder %s865_s29, 0 }
   0xf   : > { %p1331_p2 = scmp.eq.s32.totalorder %s865_s29, 3  ;;  %p202_p3 = scmp.eq.s32.totalorder %s866_s30, 3 }
  0x10   : > { %s1619_s7 = scalar_select %p1327_p1, 1, 0 }
  0x11   : > { %s1620_s8 = scalar_select %p1331_p2, 1, 0 }
  0x12   : > { %p1337_p4 = por %p1327_p1, %p58_p0  ;;  %p867_p5 = scmp.ge.s32.totalorder %s1227_s28, 1 }
  0x13   : > { %p1342_p6 = por %p202_p3, %p58_p0  ;;  %p209_p7 = scmp.lt.s32.totalorder %s1227_s28, 5 }
  0x14   : > { %s1621_s9 = scalar_select %p1337_p4, 1, 0 }
  0x15   : > { %s1622_s10 = scalar_select %p1342_p6, 1, 0 }
  0x16   : > { %p1347_p8 = pnand %p867_p5, %p209_p7  ;;  %s1229_s12 = smov [#allocation5]  }
  0x17   : > { %1623 = sst [smem:[#allocation16_spill]] %s1622_s10  ;;  %s227_s13 = sshll.u32 %s1229_s12, 4  ;;  %s228_s13 = int_to_ptr.vmem [resolvable:$true] %s227_s13 }
  0x18   : > { %s1624_s11 = scalar_select %p1347_p8, 1, 0 }
  0x19   : > { %p946_p9 = pneg %p1347_p8  ;;  %s1626_s3 = sld [smem:[#allocation19_spill]] }
  0x1b   : > { %p1355_p10 = pnand %p946_p9, %p1327_p1 }
  0x1d   : > { %p1097_p12 = pneg %p1355_p10 }
  0x1f   : > { %s1095_s17 = scalar_lea.hbm %s1626_s3, 1024 }
  0x20   : > { %p1096_p11 = scmp.ne.s32.totalorder %s1626_s3, %s1095_s17  ;;  %p1102_p3 = scmp.lt.u32.totalorder %s1095_s17, %s1626_s3 }
  0x22   : > { %p1098_p13 = pnand %p1097_p12, %p1096_p11 }
  0x24   : > { %p1099_p0 = pneg %p1098_p13 }
  0x26   : > { %p1104_p5 = pnand %p1102_p3, %p1099_p0 }
  0x28   : > { %1107 = shalt.err (!%p1104_p5)
}
  0x29   : > { %s1108_s30 = scalar_lea.vmem %s228_s13, 1024  ;;  %p1116_p1 = scmp.lt.s32.totalorder %s228_s13, %s228_s13 }
  0x2a   : > { %p1109_p7 = scmp.ne.s32.totalorder %s228_s13, %s1108_s30  ;;  %p1117_p4 = scmp.lt.s32.totalorder %s1108_s30, %s1108_s30 }
  0x2c   : > { %p1111_p9 = pnand %p1109_p7, %p1097_p12  ;;  %p1118_p8 = por %p1117_p4, %p1116_p1 }
  0x2e   : > { %p1112_p6 = pneg %p1111_p9 }
  0x30   : > { %p1119_p2 = pnand %p1118_p8, %p1112_p6 }
  0x32   : > { %1122 = shalt.err (!%p1119_p2)
}
  0x33   : > { %s1607_s12 = smov 128   ;;  %s1608_s15 = smov 8  }
  0x34   : > { %949 = dma.hbm_to_vmem [thread:$0]  (!%p1355_p10), %s1626_s3, 1024, %s228_s13, [#allocation6], %s1607_s12, %s1607_s12, %s1608_s15  }
  0x35   : > { %s33_s18 = sadd.s32 1, %s1219_s26  ;;  %s36_s19 = sadd.s32 1, %s1223_s27 }
  0x36   : > { %p34_p1 = scmp.ge.s32.totalorder %s33_s18, 2  ;;  %s45_s20 = sadd.s32 1, %s1207_s23 }
  0x37   : > { %p52_p2 = scmp.ne.s32.totalorder %s1207_s23, %s1203_s22  ;;  %p53_p4 = scmp.eq.s32.totalorder %s1227_s28, 0 }
  0x38   : > { %s1652_s18 = smov (%p34_p1, %s33_s18), 0  ;;  %s1654_s19 = smov (!%p34_p1, %s36_s19), %s1223_s27 }
  0x39   : > { %1627 = sst [smem:[#allocation17_spill]] %s1652_s18  ;;  %s41_s14 = ssub.s32 %s1219_s26, %s1652_s18 }
  0x3a   : > { %p38_p6 = scmp.ge.s32.totalorder %s1654_s19, 2  ;;  %p1628_p8 = scmp.ne.s32.totalorder %s1620_s8, 0 }
  0x3b   : > { %p1395_p10 = por %p53_p4, %p52_p2  ;;  %p959_p12 = scmp.lt.s32.totalorder %s1227_s28, 4 }
  0x3c   : > { %p1391_p11 = por %p1628_p8, %p52_p2  ;;  %s1656_s19 = smov (%p38_p6, %s1654_s19), 0 }
  0x3d   : > { %1631 = sst [smem:[#allocation18_spill]] %s1656_s19  ;;  %s244_s30 = sand.u32 1, %s1207_s23  }
  0x3e   : > { %s871_s16 = sshll.u32 %s1219_s26, 1  ;;  %s40_s17 = ssub.s32 %s1223_s27, %s1656_s19 }
  0x3f   : > { %s42_s12 = sor.u32 %s41_s14, %s40_s17  ;;  %s870_s15 = sshll.u32 %s244_s30, 4 }
  0x40   : > { %p43_p13 = scmp.eq.s32.totalorder %s42_s12, 0  ;;  %s872_s8 = sshll.u32 %s1223_s27, 2 }
  0x41   : > { %s248_s3 = scalar_lea.vmem [#allocation2], %s870_s15  ;;  %s254_s21 = sadd.s32 %s872_s8, %s871_s16 }
  0x42   : > { %s257_s18 = sshll.u32 %s248_s3, 4  ;;  %s873_s6 = sshll.u32 %s254_s21, 7  ;;  %s1410_s18 = int_to_ptr.vmem [resolvable:$true] %s257_s18 }
  0x43   : > { %s1408_s10 = scalar_select %p43_p13, %s1207_s23, %s45_s20  }
  0x44   : > { %p1416_p0 = pnand %p959_p12, %p1395_p10  ;;  %s1423_s12 = scalar_lea.hbm %s1596_s0, %s873_s6 }
  0x45   : > { %s1425_s3 = scalar_lea.sflag [#allocation3], %s244_s30  ;;  %s1123_s21 = scalar_lea.hbm %s1423_s12, 256 }
  0x46   : > { %p1124_p3 = scmp.ne.s32.totalorder %s1423_s12, %s1123_s21  ;;  %p1125_p5 = pneg %p1416_p0 }
  0x47   : > { %s1128_s19 = scalar_lea.hbm %s1596_s0, 1024  ;;  %p1129_p1 = scmp.lt.u32.totalorder %s1423_s12, %s1596_s0 }
  0x48   : > { %p1126_p7 = pnand %p1125_p5, %p1124_p3  ;;  %p1130_p2 = scmp.lt.u32.totalorder %s1128_s19, %s1123_s21 }
  0x49   : > { %p1132_p6 = scmp.lt.u32.totalorder %s1123_s21, %s1423_s12 }
  0x4a   : > { %p1127_p9 = pneg %p1126_p7  ;;  %p1131_p4 = por %p1130_p2, %p1129_p1 }
  0x4c   : > { %p1133_p8 = por %p1132_p6, %p1131_p4 }
  0x4e   : > { %p1134_p10 = pnand %p1133_p8, %p1127_p9 }
  0x50   : > { %1137 = shalt.err (!%p1134_p10)
}
  0x51   : > { %s1138_s14 = scalar_lea.vmem %s1410_s18, 256  ;;  %s1232_s13 = smov [#allocation2]  }
  0x52   : > { %p1139_p12 = scmp.ne.s32.totalorder %s1410_s18, %s1138_s14  ;;  %s1143_s30 = sshll.u32 %s1232_s13, 4  ;;  %s1144_s30 = int_to_ptr.vmem [resolvable:$false] %s1143_s30 }
  0x53   : > { %s1145_s16 = scalar_lea.vmem %s1144_s30, 512  ;;  %p1146_p7 = scmp.lt.s32.totalorder %s1410_s18, %s1144_s30 }
  0x54   : > { %p1141_p13 = pnand %p1139_p12, %p1125_p5  ;;  %p1147_p1 = scmp.lt.s32.totalorder %s1145_s16, %s1138_s14 }
  0x56   : > { %p1142_p3 = pneg %p1141_p13  ;;  %p1148_p2 = por %p1147_p1, %p1146_p7 }
  0x58   : > { %p1149_p4 = pnand %p1148_p2, %p1142_p3 }
  0x5a   : > { %1152 = shalt.err (!%p1149_p4)
}
  0x5b   : > { %s1633_s17 = smov 8   ;;  %s1634_s8 = smov 128  }
  0x5c   : > { %953 = dma.hbm_to_vmem [thread:$0]  (!%p1416_p0), %s1423_s12, 256, %s1410_s18, %s1425_s3, %s1634_s8, %s1634_s8, %s1633_s17  }
  0x5d   : > { %p1635_p5 = scmp.ne.s32.totalorder %s1624_s11, 0 }
  0x5e   : > { %s1459_s21 = sand.u32 (!%p1635_p5), 1, %s1203_s22   ;;  %p1636_p9 = scmp.ne.s32.totalorder (!%p1635_p5), %s1621_s9, 0 }
  0x5f   : > { %269 = sbr.rel (%p1635_p5) target bundleno = 803 (0x323), region = 40  ;;  %s875_s15 = sshll.u32 (!%p1635_p5), %s1459_s21, 4 }
  0x60   : > { %s272_s26 = scalar_lea.sflag (!%p1635_p5), [#allocation3], %s1459_s21  ;;  %s275_s19 = scalar_lea.vmem (!%p1635_p5), [#allocation2], %s875_s15 }
  0x66   : > { %1186 = dma.done.wait (%p1636_p9), %s272_s26, 256  }
  0x67   : > { %1188 = vsyncadd (%p1636_p9), %s272_s26, 4294967040  ;;  %p1637_p6 = scmp.ne.s32.totalorder %s1619_s7, 0 }
  0x69   : > { %1190 = dma.done.wait (%p1637_p6), [#allocation6], 1024  }
  0x6a   : > { %1192 = vsyncadd (%p1637_p6), [#allocation6], 4294966272  ;;  %vm318_vm0 = vcmask 523264   ;;  %v316_v0 = vld [vmem:[%s275_s19] sm:$0xff]  ;;  %v317_v1 = vld [vmem:[%s275_s19 + $0x8] sm:$0xff]  ;;  %v1233_v22 = vmov 0   ;;  %v375_v40 = vlaneseq }
  0x6b   : > { %v319_v2 = vsel %vm318_vm0, %v316_v0, 0.0  ;;  %v322_v3 = vsel %vm318_vm0, %v317_v1, 0.0  ;;  %v1079_v14 = vld [vmem:[#allocation5 + $0x4] ss:$8 sps:$4 sm:$0xff]   ;;  %v1081_v15 = vld [vmem:[#allocation5] ss:$8 sps:$4 sm:$0xff]   ;;  %460 = vmatprep.mubr.bf16.mxu0 %v1233_v22 }
  0x6c   : > { %320 = vadd.xlane.f32.xlu0 %v319_v2  ;;  %428 = vmatprep.subr.bf16.mxu0 %v1079_v14  ;;  %v1082_v16 = vld [vmem:[#allocation5 + $0x14] ss:$8 sps:$4 sm:$0xff]   ;;  %v1084_v17 = vld [vmem:[#allocation5 + $0x10] ss:$8 sps:$4 sm:$0xff]   ;;  %v1085_v18 = vld [vmem:[#allocation5 + $0x24] ss:$8 sps:$4 sm:$0xff]  }
  0x6d   : > { %429 = vmatpush1.bf16.msra.mxu0 %v1081_v15  ;;  %v1087_v19 = vld [vmem:[#allocation5 + $0x20] ss:$8 sps:$4 sm:$0xff]   ;;  %v1088_v20 = vld [vmem:[#allocation5 + $0x34] ss:$8 sps:$4 sm:$0xff]   ;;  %v1090_v21 = vld [vmem:[#allocation5 + $0x30] ss:$8 sps:$4 sm:$0xff]  }
  0x6e   : > { %430 = vmatprep.subr.bf16.mxu0 %v1082_v16  ;;  %v879_v31 = vld [vmem:[%s1597_s1] ss:$0 sm:$0xff]  ;;  %v376_v41 = vshrl.u32 %v375_v40, 7  ;;  %s877_s3 = sshll.u32 %s1459_s21, 5  ;;  %vm481_vm1 = vcmask 125952   ;;  %s1234_s6 = smov 48  }
  0x6f   : > { %v880_v35 = vld [vmem:[%s1598_s2] ss:$0 sm:$0xff]  ;;  %s1235_s20 = smov 64   ;;  %s1488_s14 = scalar_lea.vmem [#allocation7], %s877_s3  ;;  %vm500_vm2 = vcmask 130048   ;;  %vm511_vm3 = vcmask 257024  }
  0x70   : > { %323 = vadd.xlane.f32.xlu0 %v322_v3  ;;  %v377_v42 = vsub.s32 0, %v376_v41  ;;  %v373_v43 = vld [vmem:[%s1600_s4] sm:$0x3]  ;;  %v381_v45 = vsub.s32 1, %v376_v41  ;;  %s1236_s13 = smov 32   ;;  %s1237_s30 = smov 112  }
  0x71   : > { %431 = vmatpush1.bf16.msra.mxu0 %v1084_v17  ;;  %s1238_s16 = smov 16   ;;  %s1239_s17 = smov 96  }
  0x72   : > { %432 = vmatprep.subr.bf16.mxu0 %v1085_v18  ;;  %v378_v44 = vrot.slane %v373_v43, %v377_v42  ;;  %v382_v49 = vrot.slane %v373_v43, %v381_v45  ;;  %s1240_s8 = smov 80   ;;  %s1498_s15 = scalar_lea.vmem [#allocation8], %s877_s3 }
  0x73   : > { %s615_s26 = scalar_lea.sflag [#allocation4], %s1459_s21  ;;  %s914_s19 = sshll.u32 (%p1391_p11), %s1211_s24, 1 }
  0x74   : > { %s915_s5 = sshll.u32 (%p1391_p11), %s1215_s25, 4  ;;  %s1638_s12 = sld [smem:[#allocation20_spill]] (%p1391_p11) }
  0x75   : > { %433 = vmatpush1.bf16.msra.mxu0 %v1087_v19  ;;  %s624_s7 = sadd.s32 (%p1391_p11), %s915_s5, %s914_s19 }
  0x76   : > { %434 = vmatprep.subr.bf16.mxu0 %v1088_v20  ;;  %s916_s9 = sshll.u32 (%p1391_p11), %s624_s7, 2 }
  0x79   : > { %435 = vmatpush1.bf16.msra.mxu0 %v1090_v21 }
  0x7a   : > { %s626_s3 = scalar_lea.vmem (%p1391_p11), %s1638_s12, %s916_s9 }
  0xf9   : > { %v321_v4 = vpop.xlane.xlu0 %320 }
  0xfa   : > { %v326_v5 = vmul.f32 0.015625, %v321_v4 }
  0xfc   : > { %v328_v6 = vsub.f32 %v316_v0, %v326_v5 }
  0xfd   : > { %v324_v7 = vpop.xlane.xlu0 %323 }
  0xfe   : > { %v327_v8 = vmul.f32 0.015625, %v324_v7  ;;  %v330_v9 = vmul.f32 %v328_v6, %v328_v6 }
 0x100   : > { %v329_v10 = vsub.f32 %v317_v1, %v327_v8  ;;  %v332_v11 = vsel %vm318_vm0, %v330_v9, 0.0 }
 0x101   : > { %333 = vadd.xlane.f32.xlu1 %v332_v11 }
 0x102   : > { %v331_v12 = vmul.f32 %v329_v10, %v329_v10 }
 0x104   : > { %v335_v13 = vsel %vm318_vm0, %v331_v12, 0.0 }
 0x105   : > { %336 = vadd.xlane.f32.xlu1 %v335_v13 }
 0x18e   : > { %v334_v23 = vpop.xlane.xlu1 %333 }
 0x18f   : > { %v338_v24 = vmul.f32 0.015625, %v334_v23 }
 0x191   : > { %v340_v25 = vadd.f32 1e-06, %v338_v24 }
 0x192   : > { %v337_v26 = vpop.xlane.xlu1 %336 }
 0x193   : > { %1091 = vrsqrt.f32 %v340_v25  ;;  %v339_v27 = vmul.f32 0.015625, %v337_v26 }
 0x195   : > { %v341_v28 = vadd.f32 1e-06, %v339_v27 }
 0x197   : > { %1093 = vrsqrt.f32 %v341_v28 }
 0x19d   : > { %v1092_v29 = vpop.eup %1091 }
 0x19e   : > { %v344_v30 = vmul.f32 %v1092_v29, %v328_v6 }
 0x1a0   : > { %v353_v34 = vmul.f32 %v879_v31, %v344_v30 }
 0x1a1   : > { %v1094_v32 = vpop.eup %1093 }
 0x1a2   : > { %v345_v33 = vmul.f32 %v1094_v32, %v329_v10  ;;  %v362_v37 = vadd.f32 %v880_v35, %v353_v34 }
 0x1a4   : > { %v354_v36 = vmul.f32 %v879_v31, %v345_v33 }
 0x1a6   : > { %v363_v38 = vadd.f32 %v880_v35, %v354_v36 }
 0x1a8   : > { %v364_v39 = vpack.c.bf16 %v363_v38, %v362_v37 }
 0x1aa   : > { %889 = vmatmul.mubr.msk.bf16.vlgmr.msra.gmra.mrb[0].mxu0 %vm318_vm0, %v364_v39 }
 0x27d   : > { %v462_v46 = vpop.f32.mrb[0].mxu0 }
 0x27e   : > { %v463_v47 = vadd.f32 %v462_v46, %v378_v44  ;;  %v464_v48 = vpop.f32.mrb[1].mxu0 }
 0x27f   : > { %v466_v50 = vpop.f32.mrb[2].mxu0  ;;  %v465_v57 = vadd.f32 %v464_v48, %v382_v49 }
 0x280   : > { %v467_v51 = vadd.f32 %v466_v50, %v378_v44  ;;  %v468_v52 = vpop.f32.mrb[3].mxu0  ;;  %v471_v53 = vmul.f32 0.25, %v463_v47 }
 0x281   : > { %v469_v54 = vadd.f32 %v468_v52, %v382_v49 }
 0x282   : > { %v1049_v55 = vpack.i.bf16 %v467_v51, %v463_v47  ;;  %v472_v56 = vmul.f32 0.25, %v467_v51  ;;  %v922_v58 = vpack.c.bf16 %v471_v53, %v471_v53 }
 0x283   : > { %v1069_v60 = vpack.i.bf16 %v469_v54, %v465_v57 }
 0x284   : > { %1050 = vrot.lane.b32.xlu1 %v1049_v55, %s1234_s6  ;;  %1045 = vrot.lane.b32.xlu0 %v1049_v55, %s1235_s20  ;;  %v923_v59 = vpack.c.bf16 %v472_v56, %v472_v56  ;;  %482 = vst.msk [vmem:[%s1488_s14] sm:$0xf] %vm481_vm1, %v922_v58 }
 0x286   : > { %483 = vst.msk [vmem:[%s1488_s14 + $0x4] sm:$0xf] %vm481_vm1, %v923_v59 }
 0x288   : > { %1055 = vrot.lane.b32.xlu1 %v1049_v55, %s1236_s13  ;;  %1070 = vrot.lane.b32.xlu0 %v1069_v60, %s1237_s30 }
 0x28c   : > { %1060 = vrot.lane.b32.xlu1 %v1049_v55, %s1238_s16  ;;  %1075 = vrot.lane.b32.xlu0 %v1069_v60, %s1239_s17 }
 0x28d   : > { %v642_v40 = vld [vmem:[%s1488_s14] sm:$0xff] (%p1391_p11)  }
 0x28e   : > { %643 = vst [vmem:[%s626_s3] sm:$0xff] (%p1391_p11), %v642_v40  }
 0x290   : > { %1065 = vrot.lane.b32.xlu1 %v1069_v60, %s1238_s16  ;;  %516 = vrot.lane.b32.xlu0 %v923_v59, %s1237_s30 }
 0x294   : > { %544 = vrot.lane.b32.xlu0 %v923_v59, %s1239_s17  ;;  %514 = vrot.lane.b32.xlu1 %v922_v58, %s1237_s30 }
 0x298   : > { %578 = vrot.lane.b32.xlu0 %v923_v59, %s1240_s8  ;;  %542 = vrot.lane.b32.xlu1 %v922_v58, %s1239_s17 }
 0x29c   : > { %576 = vrot.lane.b32.xlu1 %v922_v58, %s1240_s8 }
 0x2f6   : > { %v1051_v61 = vpop.permute.xlu1 %1050  ;;  %v1046_v62 = vpop.permute.xlu0 %1045 }
 0x2f7   : > { %v1053_v63 = vunpack.i.h.bf16 %v1051_v61  ;;  %v1052_v0 = vunpack.i.l.bf16 %v1051_v61  ;;  %v1048_v27 = vunpack.i.h.bf16 %v1046_v62  ;;  %v1047_v28 = vunpack.i.l.bf16 %v1046_v62 }
 0x2f9   : > { %v530_v1 = vsel %vm500_vm2, %v1053_v63, %v469_v54  ;;  %v529_v2 = vsel %vm500_vm2, %v1052_v0, %v465_v57 }
 0x2fa   : > { %v927_v3 = vpack.c.bf16 %v530_v1, %v530_v1  ;;  %v926_v4 = vpack.c.bf16 %v529_v2, %v529_v2  ;;  %v1056_v5 = vpop.permute.xlu1 %1055  ;;  %v1071_v6 = vpop.permute.xlu0 %1070 }
 0x2fb   : > { %v1058_v7 = vunpack.i.h.bf16 %v1056_v5  ;;  %v1057_v8 = vunpack.i.l.bf16 %v1056_v5  ;;  %v1073_v9 = vunpack.i.h.bf16 %v1071_v6  ;;  %v1072_v10 = vunpack.i.l.bf16 %v1071_v6 }
 0x2fc   : > { %899 = vst.msk [vmem:[%s1498_s15 + $0xc] sm:$0xf] %vm511_vm3, %v927_v3  ;;  %898 = vst.msk [vmem:[%s1498_s15 + $0x8] sm:$0xf] %vm511_vm3, %v926_v4 }
 0x2fd   : > { %v564_v11 = vsel %vm500_vm2, %v1058_v7, %v1073_v9  ;;  %v563_v12 = vsel %vm500_vm2, %v1057_v8, %v1072_v10 }
 0x2fe   : > { %v929_v13 = vpack.c.bf16 %v564_v11, %v564_v11  ;;  %v928_v14 = vpack.c.bf16 %v563_v12, %v563_v12  ;;  %v1061_v15 = vpop.permute.xlu1 %1060  ;;  %v1076_v16 = vpop.permute.xlu0 %1075 }
 0x2ff   : > { %v1063_v17 = vunpack.i.h.bf16 %v1061_v15  ;;  %v1062_v18 = vunpack.i.l.bf16 %v1061_v15  ;;  %v1078_v19 = vunpack.i.h.bf16 %v1076_v16  ;;  %v1077_v20 = vunpack.i.l.bf16 %v1076_v16 }
 0x300   : > { %905 = vst.msk [vmem:[%s1498_s15 + $0x14] sm:$0xf] %vm511_vm3, %v929_v13  ;;  %904 = vst.msk [vmem:[%s1498_s15 + $0x10] sm:$0xf] %vm511_vm3, %v928_v14 }
 0x301   : > { %v598_v21 = vsel %vm500_vm2, %v1063_v17, %v1078_v19  ;;  %v597_v22 = vsel %vm500_vm2, %v1062_v18, %v1077_v20 }
 0x302   : > { %v931_v23 = vpack.c.bf16 %v598_v21, %v598_v21  ;;  %v930_v24 = vpack.c.bf16 %v597_v22, %v597_v22  ;;  %v1066_v25 = vpop.permute.xlu1 %1065  ;;  %v517_v26 = vpop.permute.xlu0 %516 }
 0x303   : > { %v1068_v29 = vunpack.i.h.bf16 %v1066_v25  ;;  %v1067_v30 = vunpack.i.l.bf16 %v1066_v25  ;;  %895 = vst.msk [vmem:[%s1488_s14 + $0xc] sm:$0xf] %vm481_vm1, %v517_v26 }
 0x304   : > { %911 = vst.msk [vmem:[%s1498_s15 + $0x1c] sm:$0xf] %vm511_vm3, %v931_v23  ;;  %910 = vst.msk [vmem:[%s1498_s15 + $0x18] sm:$0xf] %vm511_vm3, %v930_v24 }
 0x305   : > { %v501_v31 = vsel %vm500_vm2, %v1047_v28, %v1067_v30  ;;  %v502_v32 = vsel %vm500_vm2, %v1048_v27, %v1068_v29 }
 0x306   : > { %v924_v33 = vpack.c.bf16 %v501_v31, %v501_v31  ;;  %v925_v34 = vpack.c.bf16 %v502_v32, %v502_v32  ;;  %v545_v35 = vpop.permute.xlu0 %544  ;;  %v515_v36 = vpop.permute.xlu1 %514 }
 0x307   : > { %901 = vst.msk [vmem:[%s1488_s14 + $0x14] sm:$0xf] %vm481_vm1, %v545_v35  ;;  %894 = vst.msk [vmem:[%s1488_s14 + $0x8] sm:$0xf] %vm481_vm1, %v515_v36 }
 0x308   : > { %512 = vst.msk [vmem:[%s1498_s15] sm:$0xf] %vm511_vm3, %v924_v33  ;;  %513 = vst.msk [vmem:[%s1498_s15 + $0x4] sm:$0xf] %vm511_vm3, %v925_v34 }
 0x309   : > { %621 = sbr.rel (!%p1391_p11) target bundleno = 792 (0x318), region = 52 }
 0x30a   : > { %v579_v37 = vpop.permute.xlu0 %578  ;;  %v543_v38 = vpop.permute.xlu1 %542 }
 0x30b   : > { %907 = vst.msk [vmem:[%s1488_s14 + $0x1c] sm:$0xf] %vm481_vm1, %v579_v37  ;;  %900 = vst.msk [vmem:[%s1488_s14 + $0x10] sm:$0xf] %vm481_vm1, %v543_v38 }
 0x30e   : > { %v577_v39 = vpop.permute.xlu1 %576  ;;  %v646_v41 = vld [vmem:[%s1488_s14 + $0x8] sm:$0xff] (%p1391_p11)  }
 0x30f   : > { %906 = vst.msk [vmem:[%s1488_s14 + $0x18] sm:$0xf] %vm481_vm1, %v577_v39  ;;  %647 = vst [vmem:[%s626_s3 + $0x10] sm:$0xff] (%p1391_p11), %v646_v41  }
 0x312   : > { %v650_v42 = vld [vmem:[%s1488_s14 + $0x10] sm:$0xff]  }
 0x313   : > { %651 = vst [vmem:[%s626_s3 + $0x20] sm:$0xff] %v650_v42  }
 0x316   : > { %v654_v43 = vld [vmem:[%s1488_s14 + $0x18] sm:$0xff]  }
 0x317   : > { %655 = vst [vmem:[%s626_s3 + $0x30] sm:$0xff] %v654_v43  }
 0x318 PF: > { %s917_s6 = sshll.u32 %s1211_s24, 1  ;;  %s918_s20 = sshll.u32 %s1215_s25, 4 }
 0x319   : > { %s702_s14 = sadd.s32 %s918_s20, %s917_s6  ;;  %s721_s13 = sshll.u32 %s1498_s15, 4  ;;  %s722_s13 = int_to_ptr.vmem [resolvable:$true] %s721_s13 }
 0x31a   : > { %s919_s30 = sshll.u32 %s702_s14, 6  ;;  %s1639_s8 = sld [smem:[#allocation21_spill]] }
 0x31b   : > { %s1241_s5 = smov 128   ;;  %s1242_s7 = smov 256  }
 0x31c   : > { %938 = sst [smem:[#allocation10]] (%p1391_p11), %s1241_s5  ;;  %s1243_s9 = smov 2  }
 0x31d   : > { %939 = sst [smem:[#allocation10 + $0x1]] (%p1391_p11), %s1242_s7  ;;  %s1244_s24 = smov 64  }
 0x31e   : > { %940 = sst [smem:[#allocation10 + $0x2]] (%p1391_p11), %s1243_s9  ;;  %s1245_s25 = smov 4  }
 0x31f   : > { %941 = sst [smem:[#allocation10 + $0x3]] (%p1391_p11), %s1244_s24  ;;  %s1246_s15 = smov [#allocation9]  }
 0x320   : > { %s704_s19 = scalar_lea.hbm %s1639_s8, %s919_s30  ;;  %942 = sst [smem:[#allocation10 + $0x4]] (%p1391_p11), %s1244_s24 }
 0x321   : > { %943 = sst [smem:[#allocation10 + $0x5]] (%p1391_p11), %s1245_s25  ;;  %s1247_s11 = smov 0  }
 0x322   : > { %944 = dma.general (%p1391_p11), %s722_s13, 512, %s704_s19, %s615_s26, %s1246_s15, [#allocation10], %s1247_s11, 0  }
 0x323 PF: > { %s1640_s18 = sld [smem:[#allocation14_spill]]  ;;  %s1641_s12 = sld [smem:[#allocation16_spill]] }
 0x324   : > { %p961_p0 = scmp.ge.s32.totalorder %s1227_s28, 2 }
 0x329   : > { %s756_s3 = sand.u32 1, %s1640_s18   ;;  %p1642_p8 = scmp.ne.s32.totalorder %s1641_s12, 0 }
 0x32a   : > { %s757_s6 = scalar_lea.sflag [#allocation4], %s756_s3 }
 0x32b   : > { %p955_p10 = pnand %p961_p0, %p1642_p8 }
 0x32d   : > { %1194 = dma.done.wait (!%p955_p10), %s757_s6, 512  }
 0x32e   : > { %1196 = vsyncadd (!%p955_p10), %s757_s6, 4294966784  ;;  %s24_s28 = sadd.s32 1, %s1227_s28   ;;  %s1643_s24 = sld [smem:[#allocation15_spill]] }
 0x32f   : > { %p21_p12 = scmp.ge.s32.totalorder %s24_s28, 6   ;;  %s1644_s26 = sld [smem:[#allocation17_spill]] }
 0x330   : > { %s1645_s29 = sld [smem:[#allocation18_spill]]  ;;  %s1646_s21 = smov %s1203_s22 }
 0x331   : > { %s1647_s22 = smov %s1207_s23  ;;  %s1648_s23 = smov %s1408_s10 }
 0x332   : > { %s1649_s25 = smov %s1223_s27  ;;  %23 = sbr.rel (!%p21_p12) target bundleno = 12 (0xc), region = 153 }
 0x336   : > { %s1650_s27 = smov %s1645_s29 }
 0x339   :  { %762 = vsyncpa [#allocation3], 1 }
 0x33a   :  { %764 = vsyncpa [#allocation3 + $0x1], 1 }
 0x33b   :  { %765 = vsyncpa [#allocation6], 1 }
 0x33c   :  { %766 = vsyncpa [#allocation4], 1 }
 0x33d   :  { %768 = vsyncpa [#allocation4 + $0x1], 1 }

</bundles_post_ra>
